<compile_context>
chip_gen: v5e
topology: v5e:2x2
jax: 0.10.0
libtpu: 0.0.40
codegen_flags: <defaults>
</compile_context>

<pallas_src>
import functools

import jax
import jax.numpy as jnp
import numpy as np
from jax import lax
from jax.experimental import pallas as pl
from jax.experimental.pallas import tpu as pltpu

SEQCharLen = 21
SMICharLen = 53
conv_filters = [[1, 32], [3, 32], [3, 64], [5, 128]]

K_MAX = max(k for k, _ in conv_filters)          # 5
PAD = (K_MAX - 1) // 2                           # 2
C_TOTAL = sum(c for _, c in conv_filters)        # 256

TARGET_ROWS_PER_STEP = 2048                      # ~bs*L GEMM rows per grid step


def _cdiv(a, b):
    return (a + b - 1) // b


# ----------------------------------------------------------------------------
# Pallas kernel: in-VMEM im2col + one (bs*L, K*E) @ (K*E, 256) MXU dot
# + bias + ReLU epilogue.  Weights / bias stay resident across all grid steps.
# ----------------------------------------------------------------------------
def conv_embed_kernel(emb_ref, w_ref, b_ref, o_ref):
    # emb_ref: (bs, L, E) bf16   — whole sequences (no cross-sequence taps)
    # w_ref:   (K*E, 256) bf16   — packed unified 5-tap conv weights
    # b_ref:   (1, 256)   f32    — packed bias
    # o_ref:   (bs, L, 256)
    emb = emb_ref[...]
    bs, L, E = emb.shape

    # per-sequence "same" zero padding, done locally in VMEM
    zpad = jnp.zeros((bs, PAD, E), emb.dtype)
    slab = jnp.concatenate([zpad, emb, zpad], axis=1)            # (bs, L+2*PAD, E)

    # im2col over the K_MAX taps (tap-major along the contraction axis),
    # built in VMEM — never materialized in HBM.
    taps = jnp.concatenate(
        [slab[:, j:j + L, :] for j in range(K_MAX)], axis=-1)    # (bs, L, K*E)
    x = taps.reshape(bs * L, K_MAX * E)

    acc = jnp.dot(x, w_ref[...], preferred_element_type=jnp.float32)
    y = jnp.maximum(acc + b_ref[...], 0.0)                       # bias + ReLU
    o_ref[...] = y.reshape(bs, L, C_TOTAL).astype(o_ref.dtype)


# ----------------------------------------------------------------------------
# One-time parameter packing (numpy, outside the per-call path).
# torch Conv1d weights (Cout, E, k) for each filter are folded into a single
# unified 5-tap weight, then flattened to (K_MAX * E, 256) for the merged dot.
# ----------------------------------------------------------------------------
def pack_conv_params(conv_params, embed_size):
    w_big = np.zeros((K_MAX, embed_size, C_TOTAL), np.float32)
    b_big = np.zeros((C_TOTAL,), np.float32)
    c_off = 0
    for (k, c_out), (w, b) in zip(conv_filters, conv_params):
        w = np.asarray(w)
        b = np.asarray(b)
        pad_k = (k - 1) // 2
        for t in range(k):
            tap = t - pad_k + PAD            # center each filter inside K_MAX taps
            w_big[tap, :, c_off:c_off + c_out] = w[:, :, t].T
        b_big[c_off:c_off + c_out] = b
        c_off += c_out
    w_flat = jnp.asarray(w_big.reshape(K_MAX * embed_size, C_TOTAL), jnp.bfloat16)
    bias = jnp.asarray(b_big.reshape(1, C_TOTAL), jnp.float32)
    return w_flat, bias


# ----------------------------------------------------------------------------
# Jitted forward.  Only the tiny embedding gather lives in XLA; padding,
# im2col, GEMM, bias and ReLU are all inside the Pallas kernel.
# ----------------------------------------------------------------------------
@functools.partial(jax.jit, static_argnames=("out_dtype",))
def short_conv_embedding(inputs, table_bf16, w_flat, bias, out_dtype=jnp.float32):
    """inputs: (B, L) int32 token ids.  Returns (B, L, 256) in out_dtype."""
    B, L = inputs.shape
    E = table_bf16.shape[1]

    emb = table_bf16[inputs]                       # (B, L, E) bf16 gather (tiny table)

    # Sequences per grid step: big enough to amortize per-step overhead, but
    # keep >=2 grid steps whenever B>=2 so v7x megacore shares the parallel axis.
    bs = max(1, min(TARGET_ROWS_PER_STEP // max(L, 1), B))
    if B >= 2:
        bs = min(bs, max(1, B // 2))
    Bp = _cdiv(B, bs) * bs
    if Bp != B:
        emb = jnp.pad(emb, ((0, Bp - B), (0, 0), (0, 0)))

    out = pl.pallas_call(
        conv_embed_kernel,
        out_shape=jax.ShapeDtypeStruct((Bp, L, C_TOTAL), out_dtype),
        grid=(Bp // bs,),
        in_specs=[
            pl.BlockSpec((bs, L, E), lambda i: (i, 0, 0)),            # embeddings
            pl.BlockSpec((K_MAX * E, C_TOTAL), lambda i: (0, 0)),     # resident weights
            pl.BlockSpec((1, C_TOTAL), lambda i: (0, 0)),             # resident bias
        ],
        out_specs=pl.BlockSpec((bs, L, C_TOTAL), lambda i: (i, 0, 0)),
        compiler_params=pltpu.CompilerParams(
            dimension_semantics=("parallel",),     # megacore-shardable grid
            vmem_limit_bytes=32 << 20,             # explicit, safe on v5e/v6e/v7x
        ),
    )(emb, w_flat, bias)

    return out[:B]                                 # drop batch padding rows


# ----------------------------------------------------------------------------
# Pure-JAX reference (mirrors the PyTorch forward exactly, f32)
# ----------------------------------------------------------------------------
def reference(inputs, table, conv_params):
    emb = table[inputs]                              # (B, L, E)
    x = jnp.transpose(emb, (0, 2, 1))                # (B, E, L)  == torch NCW
    outs = []
    for (k, _), (w, b) in zip(conv_filters, conv_params):
        pad = (k - 1) // 2
        y = lax.conv_general_dilated(
            x, w, window_strides=(1,), padding=[(pad, pad)],
            dimension_numbers=("NCH", "OIH", "NCH"))
        y = jax.nn.relu(y + b[None, :, None])
        outs.append(y)
    res = jnp.concatenate(outs, axis=1)              # (B, 256, L)
    return jnp.transpose(res, (0, 2, 1))             # (B, L, 256)


# ----------------------------------------------------------------------------
if __name__ == "__main__":
    # type=1 -> vocab = SEQCharLen = 21
    B, L, E = 2, 8, 32
    vocab = SEQCharLen

    key = jax.random.PRNGKey(0)
    k_tab, k_idx, *k_conv = jax.random.split(key, 2 + 2 * len(conv_filters))

    # deterministic synthetic parameters (shapes match nn.Embedding / nn.Conv1d)
    table = jax.random.normal(k_tab, (vocab, E), jnp.float32)
    conv_params = []
    for i, (k, c_out) in enumerate(conv_filters):
        w = jax.random.normal(k_conv[2 * i], (c_out, E, k), jnp.float32) * 0.1
        b = jax.random.normal(k_conv[2 * i + 1], (c_out,), jnp.float32) * 0.1
        conv_params.append((w, b))

    inputs = jax.random.randint(k_idx, (B, L), 0, vocab, dtype=jnp.int32)

    # hoisted, one-time packing
    w_flat, bias = pack_conv_params(conv_params, E)
    table_bf16 = table.astype(jnp.bfloat16)

    out = jax.block_until_ready(
        short_conv_embedding(inputs, table_bf16, w_flat, bias))
    ref = jax.block_until_ready(reference(inputs, table, conv_params))

    assert out.shape == (B, L, C_TOTAL), out.shape
    # bf16 operands (f32 accumulation) vs f32 reference -> loosened tolerance.
    np.testing.assert_allclose(np.asarray(out), np.asarray(ref),
                               rtol=5e-2, atol=5e-2)
    print("KERNEL_OK")
</pallas_src>

<mosaic_0001>
module attributes {stable_mosaic.version = 11 : i64} {
  func.func @conv_embed_kernel(%arg0: i32, %arg1: memref<1x8x32xbf16, #tpu.memory_space<vmem>>, %arg2: memref<160x256xbf16, #tpu.memory_space<vmem>>, %arg3: memref<1x256xf32, #tpu.memory_space<vmem>>, %arg4: memref<1x8x256xf32, #tpu.memory_space<vmem>>) attributes {dimension_semantics = [#tpu.dimension_semantics<parallel>], iteration_bounds = array<i64: 2>, scalar_prefetch = 0 : i64, scratch_operands = 0 : i64, tpu.core_type = #tpu.core_type<tc>, window_params = [{transform_indices = @transform_0, window_bounds = array<i64: 1, 8, 32>}, {pipeline_mode = #tpu.pipeline_mode<synchronous>, transform_indices = @transform_1, window_bounds = array<i64: 160, 256>}, {pipeline_mode = #tpu.pipeline_mode<synchronous>, transform_indices = @transform_2, window_bounds = array<i64: 1, 256>}, {transform_indices = @transform_3, window_bounds = array<i64: 1, 8, 256>}]} {
    %c0 = arith.constant 0 : index
    %c0_0 = arith.constant 0 : index
    %c0_1 = arith.constant 0 : index
    %0 = vector.load %arg1[%c0, %c0_0, %c0_1] : memref<1x8x32xbf16, #tpu.memory_space<vmem>>, vector<1x8x32xbf16>
    %cst = arith.constant 0.000000e+00 : bf16
    %1 = vector.broadcast %cst : bf16 to vector<1x2x32xbf16>
    %2 = tpu.concatenate %1, %0, %1 in 1 : vector<1x2x32xbf16>, vector<1x8x32xbf16>, vector<1x2x32xbf16> -> vector<1x12x32xbf16>
    %3 = vector.extract_strided_slice %2 {offsets = [0, 0, 0], sizes = [1, 8, 32], strides = [1, 1, 1]} : vector<1x12x32xbf16> to vector<1x8x32xbf16>
    %4 = vector.extract_strided_slice %2 {offsets = [0, 1, 0], sizes = [1, 8, 32], strides = [1, 1, 1]} : vector<1x12x32xbf16> to vector<1x8x32xbf16>
    %5 = vector.extract_strided_slice %2 {offsets = [0, 2, 0], sizes = [1, 8, 32], strides = [1, 1, 1]} : vector<1x12x32xbf16> to vector<1x8x32xbf16>
    %6 = vector.extract_strided_slice %2 {offsets = [0, 3, 0], sizes = [1, 8, 32], strides = [1, 1, 1]} : vector<1x12x32xbf16> to vector<1x8x32xbf16>
    %7 = vector.extract_strided_slice %2 {offsets = [0, 4, 0], sizes = [1, 8, 32], strides = [1, 1, 1]} : vector<1x12x32xbf16> to vector<1x8x32xbf16>
    %8 = tpu.concatenate %3, %4, %5, %6, %7 in 2 : vector<1x8x32xbf16>, vector<1x8x32xbf16>, vector<1x8x32xbf16>, vector<1x8x32xbf16>, vector<1x8x32xbf16> -> vector<1x8x160xbf16>
    %9 = vector.shape_cast %8 : vector<1x8x160xbf16> to vector<8x160xbf16>
    %c0_2 = arith.constant 0 : index
    %c0_3 = arith.constant 0 : index
    %10 = vector.load %arg2[%c0_2, %c0_3] : memref<160x256xbf16, #tpu.memory_space<vmem>>, vector<160x256xbf16>
    %cst_4 = arith.constant dense<0.000000e+00> : vector<8x256xf32>
    %11 = tpu.matmul %9, %10, %cst_4 {dimension_numbers = #tpu.dot_dimension_numbers<[1], [0], [0], [1], [0, 0, 1, 1], [], []>} : vector<8x160xbf16>, vector<160x256xbf16>, vector<8x256xf32> -> vector<8x256xf32>
    %c0_5 = arith.constant 0 : index
    %c0_6 = arith.constant 0 : index
    %12 = vector.load %arg3[%c0_5, %c0_6] : memref<1x256xf32, #tpu.memory_space<vmem>>, vector<1x256xf32>
    %13 = vector.broadcast %12 : vector<1x256xf32> to vector<8x256xf32>
    %14 = arith.addf %11, %13 : vector<8x256xf32>
    %cst_7 = arith.constant 0.000000e+00 : f32
    %15 = vector.broadcast %cst_7 : f32 to vector<8x256xf32>
    %16 = arith.maximumf %14, %15 : vector<8x256xf32>
    %17 = vector.shape_cast %16 : vector<8x256xf32> to vector<1x8x256xf32>
    %c0_8 = arith.constant 0 : index
    %c0_9 = arith.constant 0 : index
    %c0_10 = arith.constant 0 : index
    %18 = vector.load %arg4[%c0_8, %c0_9, %c0_10] : memref<1x8x256xf32, #tpu.memory_space<vmem>>, vector<1x8x256xf32>
    tpu.vector_store %arg4[%c0_8, %c0_9, %c0_10], %17 {strides = array<i32>} : memref<1x8x256xf32, #tpu.memory_space<vmem>>, vector<1x8x256xf32>,
    return
  }
  func.func @transform_0(%arg0: i32) -> (i32, i32, i32) {
    %c0_i32 = arith.constant 0 : i32
    %c0_i32_0 = arith.constant 0 : i32
    %c0_i32_1 = arith.constant 0 : i32
    return %arg0, %c0_i32, %c0_i32_0 : i32, i32, i32
  }
  func.func @transform_1(%arg0: i32) -> (i32, i32) {
    %c0_i32 = arith.constant 0 : i32
    %c0_i32_0 = arith.constant 0 : i32
    %c0_i32_1 = arith.constant 0 : i32
    return %c0_i32, %c0_i32_0 : i32, i32
  }
  func.func @transform_2(%arg0: i32) -> (i32, i32) {
    %c0_i32 = arith.constant 0 : i32
    %c0_i32_0 = arith.constant 0 : i32
    %c0_i32_1 = arith.constant 0 : i32
    return %c0_i32, %c0_i32_0 : i32, i32
  }
  func.func @transform_3(%arg0: i32) -> (i32, i32, i32) {
    %c0_i32 = arith.constant 0 : i32
    %c0_i32_0 = arith.constant 0 : i32
    %c0_i32_1 = arith.constant 0 : i32
    return %arg0, %c0_i32, %c0_i32_0 : i32, i32, i32
  }
}

</mosaic_0001>

<bundles_post_ra>
// kernel: short_conv_embedding.1
= control target key start
LH: loop header
LB: loop body
LE: loop exit
PB: predicated region body
PF: predicated region fallthrough
CT: control target
= control target key end

     0   :  { %8 = vsyncpa [#allocation3], 0  ;;  %s899_s0 = inlined_call_operand.vmem [shape: bf16[2,8,32], index: 0, kind: input, shape index: {}]   ;;  %s900_s1 = inlined_call_operand.hbm [shape: bf16[160,256], index: 1, kind: input, shape index: {}]   ;;  %s901_s2 = inlined_call_operand.vmem [shape: f32[1,256], index: 2, kind: input, shape index: {}]   ;;  %s902_s3 = inlined_call_operand.hbm [shape: f32[2,8,256], index: 3, kind: output, shape index: {}]  }
   0x1   :  { %9 = vsyncpa [#allocation4], 0 }
   0x2   :  { %11 = vsyncpa [#allocation4 + $0x1], 0  ;;  %s791_s12 = smov 0   ;;  %s793_s13 = smov 0  }
   0x3   :  { %s795_s14 = smov 0   ;;  %s797_s15 = smov 0  }
   0x4 LB: > { %s812_s16 = sadd.s32 4294967295, %s763_s15   ;;  %s496_s17 = sadd.s32 4294967294, %s763_s15   ;;  %s763_s15 = sphi %s797_s15, %s908_s15   ;;  %s759_s14 = sphi %s795_s14, %s907_s14   ;;  %s755_s13 = sphi %s793_s13, %s906_s13   ;;  %s751_s12 = sphi %s791_s12, %s905_s12  }
   0x5   : > { %s816_s18 = sadd.s32 1, %s763_s15   ;;  %s92_s19 = sadd.s32 1, %s759_s14 }
   0x6   : > { %s89_s20 = ssub.s32 %s763_s15, %s816_s18  ;;  %p102_p0 = scmp.ne.s32.totalorder %s759_s14, %s755_s13 }
   0x7   : > { %p90_p1 = scmp.eq.s32.totalorder %s89_s20, 0  ;;  %p103_p2 = scmp.eq.s32.totalorder %s812_s16, 1 }
   0x8   : > { %p108_p3 = scmp.ne.s32.totalorder %s755_s13, %s751_s12  ;;  %p109_p4 = scmp.eq.s32.totalorder %s496_s17, 1 }
   0x9   : > { %s827_s21 = scalar_select %p90_p1, %s759_s14, %s92_s19  }
   0xa   : > { %p829_p5 = por %p103_p2, %p102_p0  ;;  %p833_p6 = por %p109_p4, %p108_p3 }
   0xb   : > { %p497_p7 = scmp.ge.s32.totalorder %s763_s15, 1  ;;  %p116_p8 = scmp.lt.s32.totalorder %s763_s15, 3 }
   0xc   : > { %p626_p9 = scmp.eq.s32.totalorder %s812_s16, 0  ;;  %s127_s26 = sshll.u32 %s900_s1, 4  ;;  %s128_s26 = int_to_ptr.hbm [resolvable:$true] %s127_s26 }
   0xd   : > { %p117_p10 = pnand %p497_p7, %p116_p8  ;;  %s765_s27 = smov [#allocation2]  }
   0xe   : > { %s129_s28 = sshll.u32 %s765_s27, 4  ;;  %s766_s29 = smov 128   ;;  %s130_s28 = int_to_ptr.vmem [resolvable:$true] %s129_s28 }
   0xf   : > { %p618_p11 = pneg %p117_p10  ;;  %s767_s30 = smov 8  }
  0x10   : > { %155 = sbr.rel (%p117_p10) target bundleno = 310 (0x136), region = 32 }
  0x11   : > { %p619_p12 = pnand %p626_p9, %p618_p11 }
  0x13   : > { %621 = dma.hbm_to_vmem [thread:$0]  (!%p619_p12), %s128_s26, 2560, %s130_s28, [#allocation3], %s766_s29, %s766_s29, %s767_s30  }
  0x15   : > { %742 = dma.done.wait (%p626_p9), [#allocation3], 2560  }
  0x16   : > { %744 = vsyncadd (%p626_p9), [#allocation3], 4294964736  ;;  %p179_p13 = scmp.lt.s32.totalorder %s812_s16, 1  ;;  %v562_v1 = vld [vmem:[#allocation2 + $0x70] sm:$0xf]  ;;  %vm189_vm0 = vcmask 1040384  }
  0x17   : > { %v606_v2 = vld [vmem:[#allocation2 + $0x74] sm:$0xf0]  ;;  %v605_v5 = vld [vmem:[#allocation2 + $0x74] sm:$0xf]  ;;  %v564_v6 = vld [vmem:[#allocation2 + $0x78] sm:$0xf0] }
  0x18   : > { %s180_s4 = scalar_select %p179_p13, %s812_s16, 1  ;;  %v563_v4 = vor.u32 %v606_v2, %v562_v1  ;;  %v554_v7 = vld [vmem:[#allocation2 + $0x60] sm:$0xf]  ;;  %v567_v8 = vor.u32 %v605_v5, %v564_v6  ;;  %v604_v9 = vld [vmem:[#allocation2 + $0x64] sm:$0xf0]  ;;  %vm193_vm1 = vcmask 1044480  }
  0x19   : > { %v603_v10 = vld [vmem:[#allocation2 + $0x64] sm:$0xf]  ;;  %v556_v11 = vld [vmem:[#allocation2 + $0x68] sm:$0xf0]  ;;  %v555_v13 = vor.u32 %v604_v9, %v554_v7  ;;  %v546_v15 = vld [vmem:[#allocation2 + $0x50] sm:$0xf] }
  0x1a   : > { %s503_s5 = sshll.u32 %s180_s4, 2  ;;  %352 = vmatpush.bf16.msra.mxu0 %v563_v4  ;;  %378 = vmatpush.bf16.msra.mxu2 %v567_v8  ;;  %v559_v14 = vor.u32 %v603_v10, %v556_v11  ;;  %v602_v16 = vld [vmem:[#allocation2 + $0x54] sm:$0xf0]  ;;  %v601_v18 = vld [vmem:[#allocation2 + $0x54] sm:$0xf]  ;;  %s768_s9 = smov 32  }
  0x1b   : > { %s182_s8 = scalar_lea.vmem %s899_s0, %s503_s5  ;;  %v548_v19 = vld [vmem:[#allocation2 + $0x58] sm:$0xf0]  ;;  %v547_v21 = vor.u32 %v602_v16, %v546_v15  ;;  %v538_v22 = vld [vmem:[#allocation2 + $0x40] sm:$0xf]  ;;  %v609_v23 = vld [vmem:[#allocation2 + $0x94] sm:$0xf] }
  0x1c   : > { %v184_v0 = vld [vmem:[%s182_s8] sm:$0xf]  ;;  %v551_v25 = vor.u32 %v601_v18, %v548_v19  ;;  %v600_v26 = vld [vmem:[#allocation2 + $0x44] sm:$0xf0]  ;;  %v580_v27 = vld [vmem:[#allocation2 + $0x98] sm:$0xf0] }
  0x1d   : > { %v186_v3 = vunpack.c.l.b16 %v184_v0  ;;  %v599_v30 = vld [vmem:[#allocation2 + $0x44] sm:$0xf]  ;;  %v540_v31 = vld [vmem:[#allocation2 + $0x48] sm:$0xf0]  ;;  %v583_v32 = vor.u32 %v609_v23, %v580_v27  ;;  %v539_v38 = vor.u32 %v600_v26, %v538_v22  ;;  %v530_v40 = vld [vmem:[#allocation2 + $0x30] sm:$0xf] }
  0x1e   : > { %353 = vmatpush.bf16.msra.mxu0 %v555_v13  ;;  %379 = vmatpush.bf16.msra.mxu2 %v559_v14  ;;  %v607_v33 = vld [vmem:[#allocation2 + $0x84] sm:$0xf]  ;;  %v572_v37 = vld [vmem:[#allocation2 + $0x88] sm:$0xf0]  ;;  %v543_v39 = vor.u32 %v599_v30, %v540_v31  ;;  %v598_v43 = vld [vmem:[#allocation2 + $0x34] sm:$0xf0] }
  0x1f   : > { %v187_v12 = vpack.c.b16 %v186_v3, %v186_v3  ;;  %397 = vmatpush.bf16.msra.mxu3 %v583_v32  ;;  %v597_v44 = vld [vmem:[#allocation2 + $0x34] sm:$0xf]  ;;  %v532_v45 = vld [vmem:[#allocation2 + $0x38] sm:$0xf0]  ;;  %v575_v46 = vor.u32 %v607_v33, %v572_v37  ;;  %s769_s10 = smov 96   ;;  %v531_v47 = vor.u32 %v598_v43, %v530_v40  ;;  %s770_s11 = smov 64  }
  0x20   : > { %v535_v48 = vor.u32 %v597_v44, %v532_v45  ;;  %v522_v49 = vld [vmem:[#allocation2 + $0x20] sm:$0xf]  ;;  %v596_v50 = vld [vmem:[#allocation2 + $0x24] sm:$0xf0]  ;;  %v595_v51 = vld [vmem:[#allocation2 + $0x24] sm:$0xf] }
  0x21   : > { %v188_v17 = vrot.slane %v187_v12, 7  ;;  %v524_v52 = vld [vmem:[#allocation2 + $0x28] sm:$0xf0]  ;;  %v523_v54 = vor.u32 %v596_v50, %v522_v49  ;;  %v578_v56 = vld [vmem:[#allocation2 + $0x90] sm:$0xf]  ;;  %vm213_vm2 = vcmask 261120  }
  0x22   : > { %354 = vmatpush.bf16.msra.mxu0 %v547_v21  ;;  %380 = vmatpush.bf16.msra.mxu2 %v551_v25  ;;  %v527_v55 = vor.u32 %v595_v51, %v524_v52  ;;  %v610_v57 = vld [vmem:[#allocation2 + $0x94] sm:$0xf0]  ;;  %v514_v60 = vld [vmem:[#allocation2 + $0x10] sm:$0xf]  ;;  %v593_v63 = vld [vmem:[#allocation2 + $0x14] sm:$0xf] }
  0x23   : > { %v192_v20 = vsel %vm189_vm0, 0, %v188_v17  ;;  %398 = vmatpush.bf16.msra.mxu3 %v575_v46  ;;  %v579_v58 = vor.u32 %v610_v57, %v578_v56  ;;  %v594_v61 = vld [vmem:[#allocation2 + $0x14] sm:$0xf0]  ;;  %v516_v0 = vld [vmem:[#allocation2 + $0x18] sm:$0xf0]  ;;  %vm216_vm3 = vcmask 523264  }
  0x24   : > { %v854_v24 = vsel %vm193_vm1, %v192_v20, 0  ;;  %v515_v62 = vor.u32 %v594_v61, %v514_v60  ;;  %v570_v1 = vld [vmem:[#allocation2 + $0x80] sm:$0xf]  ;;  %v519_v2 = vor.u32 %v593_v63, %v516_v0  ;;  %v608_v3 = vld [vmem:[#allocation2 + $0x84] sm:$0xf0]  ;;  %vm219_vm4 = vcmask 785408  }
  0x25   : > { %v195_v28 = vshrl.u32 %v854_v24, 16  ;;  %v197_v29 = vshll.u32 %v854_v24, 16  ;;  %v204_v53 = vrot.slane %v854_v24, 1  ;;  %v212_v59 = vrot.slane %v854_v24, 2  ;;  %371 = vmatpush.bf16.msra.mxu1 %v579_v58  ;;  %v506_v4 = vld [vmem:[#allocation2] sm:$0xf] }
  0x26   : > { %355 = vmatpush.bf16.msra.mxu0 %v539_v38  ;;  %381 = vmatpush.bf16.msra.mxu2 %v543_v39  ;;  %v592_v5 = vld [vmem:[#allocation2 + $0x4] sm:$0xf0]  ;;  %v571_v6 = vor.u32 %v608_v3, %v570_v1  ;;  %v591_v8 = vld [vmem:[#allocation2 + $0x4] sm:$0xf]  ;;  %v508_v9 = vld [vmem:[#allocation2 + $0x8] sm:$0xf0] }
  0x27   : > { %v199_v34 = vrot.slane %v197_v29, 1  ;;  %v207_v35 = vrot.slane %v195_v28, 1  ;;  %v208_v36 = vrot.slane %v197_v29, 2  ;;  %585 = vmatmul.msk.bf16.vlgmr.msra.gmra.mxu3 %vm213_vm2, %v212_v59  ;;  %v507_v7 = vor.u32 %v592_v5, %v506_v4  ;;  %v243_v21 = vld [vmem:[%s901_s2] sm:$0x3]  ;;  %s176_s20 = sand.u32 1, %s755_s13  }
  0x28   : > { %v511_v10 = vor.u32 %v591_v8, %v508_v9  ;;  %v245_v22 = vperm.slane %v243_v21, 0  ;;  %s502_s24 = sshll.u32 %s176_s20, 4  ;;  %s611_s25 = sshll.u32 %s812_s16, 4  ;;  %v246_v26 = vperm.slane %v243_v21, 1 }
  0x29   : > { %v200_v41 = vor.u32 %v199_v34, %v195_v28  ;;  %v209_v42 = vor.u32 %v208_v36, %v207_v35  ;;  %372 = vmatpush.bf16.msra.mxu1 %v571_v6  ;;  %s420_s28 = scalar_lea.hbm %s902_s3, %s611_s25  ;;  %s178_s29 = scalar_lea.vmem [#allocation5], %s502_s24 }
  0x2a   : > { %356 = vmatpush.bf16.msra.mxu0 %v531_v47  ;;  %382 = vmatpush.bf16.msra.mxu2 %v535_v48  ;;  %s422_s30 = sshll.u32 %s178_s29, 4  ;;  %s424_s4 = sshll.u32 %s420_s28, 4  ;;  %s423_s30 = int_to_ptr.vmem [resolvable:$true] %s422_s30  ;;  %s425_s4 = int_to_ptr.hbm [resolvable:$true] %s424_s4 }
  0x2b   : > { %201 = vrot.lane.b32.xlu0 %v200_v41, %s768_s9  ;;  %210 = vrot.lane.b32.xlu1 %v209_v42, %s769_s10  ;;  %s409_s16 = scalar_lea.sflag [#allocation4], %s176_s20  ;;  %s711_s5 = sshra.s32 %s425_s4, 4  ;;  %s712_s5 = int_to_ptr.hbm [resolvable:$true] %s711_s5 }
  0x2c   : > { %584 = vmatmul.msk.bf16.vlgmr.msra.gmra.mxu1 %vm213_vm2, %v212_v59  ;;  %s713_s6 = scalar_lea.hbm %s712_s5, 16  ;;  %s717_s9 = scalar_lea.hbm %s902_s3, 32 }
  0x2d   : > { %p714_p0 = scmp.ne.s32.totalorder %s712_s5, %s713_s6  ;;  %p718_p3 = scmp.lt.s32.totalorder %s712_s5, %s902_s3 }
  0x2e   : > { %357 = vmatpush.bf16.msra.mxu0 %v523_v54  ;;  %383 = vmatpush.bf16.msra.mxu2 %v527_v55  ;;  %p719_p4 = scmp.lt.s32.totalorder %s717_s9, %s713_s6 }
  0x2f   : > { %p715_p1 = pnand %p714_p0, %p829_p5 }
  0x30   : > { %p720_p7 = por %p719_p4, %p718_p3 }
  0x31   : > { %p716_p2 = pneg %p715_p1 }
  0x32   : > { %358 = vmatpush.bf16.msra.mxu0 %v515_v62  ;;  %384 = vmatpush.bf16.msra.mxu2 %v519_v2 }
  0x33   : > { %205 = vrot.lane.b32.xlu0 %v204_v53, %s770_s11  ;;  %p721_p8 = pnand %p720_p7, %p716_p2 }
  0x36   : > { %359 = vmatpush.bf16.msra.mxu0 %v507_v7  ;;  %385 = vmatpush.bf16.msra.mxu2 %v511_v10 }
  0x9d   : > { %v202_v11 = vpop.permute.xlu0 %201  ;;  %v211_v12 = vpop.permute.xlu1 %210 }
  0x9e   : > { %v215_v13 = vsel %vm213_vm2, %v854_v24, %v202_v11 }
  0xa5   : > { %v206_v14 = vpop.permute.xlu0 %205 }
  0xa6   : > { %v218_v15 = vsel %vm216_vm3, %v215_v13, %v206_v14 }
  0xa7   : > { %v221_v16 = vsel %vm219_vm4, %v218_v15, %v211_v12 }
  0xa8   : > { %360 = vmatmul.bf16.vlgmr.msra.gmra.mxu0 %v221_v16  ;;  %386 = vmatmul.bf16.vlgmr.msra.gmra.mxu2 %v221_v16 }
  0xa9   : > { %v374_v17 = vpop.f32.mrf.mxu1 }
  0xaa   : > { %v400_v18 = vpop.f32.mrf.mxu3 }
  0xb1   : > { %v376_v19 = vpop.f32.mrf.mxu1 }
  0xb2   : > { %v402_v20 = vpop.f32.mrf.mxu3 }
 0x125   : > { %v361_v23 = vpop.f32.mrf.mxu0 }
 0x126   : > { %v362_v25 = vadd.f32 %v361_v23, %v245_v22 }
 0x128   : > { %v375_v24 = vadd.f32 %v374_v17, %v362_v25 }
 0x12a   : > { %v404_v27 = vmax.f32 %v375_v24, 0.0 }
 0x12b   : > { %v387_v28 = vpop.f32.mrf.mxu2 }
 0x12c   : > { %406 = vst [vmem:[%s178_s29] sm:$0xff] %v404_v27  ;;  %v388_v29 = vadd.f32 %v387_v28, %v246_v26 }
 0x12d   : > { %v363_v30 = vpop.f32.mrf.mxu0 }
 0x12e   : > { %v401_v31 = vadd.f32 %v400_v18, %v388_v29 }
 0x130   : > { %v405_v32 = vmax.f32 %v401_v31, 0.0 }
 0x132   : > { %407 = vst [vmem:[%s178_s29 + $0x8] sm:$0xff] %v405_v32 }
 0x133   : > { %v389_v33 = vpop.f32.mrf.mxu2 }
 0x134   : > { %724 = shalt.err (!%p721_p8)
}
 0x135   : > { %616 = dma.vmem_to_hbm [thread:$0]  (%p829_p5), %s423_s30, 256, %s425_s4, %s409_s16  }
 0x136 PF: > { %p628_p9 = scmp.ge.s32.totalorder %s763_s15, 2  ;;  %s436_s17 = sand.u32 1, %s751_s12  }
 0x137   : > { %s437_s19 = scalar_lea.sflag [#allocation4], %s436_s17 }
 0x138   : > { %p623_p10 = pnand %p628_p9, %p833_p6 }
 0x13a   : > { %p624_p11 = pneg %p623_p10 }
 0x13c   : > { %746 = dma.done.wait (%p624_p11), %s437_s19, 256  }
 0x13d   : > { %748 = vsyncadd (%p624_p11), %s437_s19, 4294967040  ;;  %p14_p12 = scmp.ge.s32.totalorder %s816_s18, 4   ;;  %s905_s12 = smov %s755_s13 }
 0x13e   : > { %s906_s13 = smov %s759_s14  ;;  %s907_s14 = smov %s827_s21 }
 0x13f   : > { %s908_s15 = smov %s816_s18  ;;  %16 = sbr.rel (!%p14_p12) target bundleno = 4 (0x4), region = 72 }
 0x144   :  { %443 = vsyncpa [#allocation3], 1 }
 0x145   :  { %445 = vsyncpa [#allocation3 + $0x1], 1 }
 0x146   :  { %446 = vsyncpa [#allocation4], 1 }
 0x147   :  { %448 = vsyncpa [#allocation4 + $0x1], 1 }

</bundles_post_ra>
